<compile_context>
chip_gen: v5e
topology: v5e:2x2
jax: 0.10.0
libtpu: 0.0.40
codegen_flags: <defaults>
</compile_context>

<pallas_src>
import functools

import jax
import jax.numpy as jnp
from jax.experimental import pallas as pl
from jax.experimental.pallas import tpu as pltpu


# ----------------------------- Pallas kernel -------------------------------
def _linear_kernel(x_ref, w_ref, b_ref, o_ref, acc_ref, *, K, tk, mask_k_tail):
    k = pl.program_id(2)

    @pl.when(k == 0)
    def _init():
        # Fold the bias into the accumulator init (saves a zeros store and a
        # full-tile VPU add in the epilogue).
        acc_ref[...] = jnp.broadcast_to(
            b_ref[...].astype(jnp.float32), acc_ref.shape
        )

    x = x_ref[...]
    w = w_ref[...]
    if mask_k_tail:
        # The last K block is partial: Pallas fills the out-of-bounds region
        # with garbage (possibly NaN/Inf).  Zero the tail on BOTH operands so
        # the padded region contributes exactly 0 (0 * garbage could be NaN).
        kcol = k * tk + jax.lax.broadcasted_iota(jnp.int32, x.shape, 1)
        x = jnp.where(kcol < K, x, 0).astype(x_ref.dtype)
        krow = k * tk + jax.lax.broadcasted_iota(jnp.int32, w.shape, 0)
        w = jnp.where(krow < K, w, 0).astype(w_ref.dtype)

    acc_ref[...] += jnp.dot(x, w, preferred_element_type=jnp.float32)

    @pl.when(k == pl.num_programs(2) - 1)
    def _finalize():
        o_ref[...] = acc_ref[...].astype(o_ref.dtype)


# Problems below this FLOP count are pure launch/DMA overhead for Pallas.
_PALLAS_MIN_FLOPS = 1 << 17


def _pick_tile(dim, pref):
    # Full-dim blocks are always layout-legal (no OOB region at all); use the
    # aligned preferred tile only when the dimension is at least that large.
    return pref if dim >= pref else dim


def pallas_linear(x, w, b, *, tm=512, tn=512, tk=512, force_pallas=False):
    """y = x @ w + b via a tiled (M, N, K) Pallas TPU kernel (bf16 MXU, f32 acc)."""
    M, K = x.shape
    K2, N = w.shape
    assert K == K2 and b.shape == (N,)

    if not force_pallas and 2 * M * N * K < _PALLAS_MIN_FLOPS:
        # Tiny-problem fallback: XLA's fused HLO beats a pallas_call here.
        return x @ w + b

    out_dtype = x.dtype

    # bf16 operands for the MXU; accumulation stays f32 inside the kernel.
    xb = x.astype(jnp.bfloat16)
    wb = w.astype(jnp.bfloat16)
    bp = b.astype(jnp.float32).reshape(1, N)

    # Effective tile sizes.  Preferred tiles are multiples of 256 (MXU width on
    # v6e/v7x) and 16 (bf16 sublane packing); small dims use full-dim blocks so
    # nothing needs to be padded in HBM.
    tm_e = _pick_tile(M, tm)
    tn_e = _pick_tile(N, tn)
    tk_e = _pick_tile(K, tk)

    # Megacore (v7x has 2 TensorCores): make sure the parallel (i, j) axes have
    # at least 2 blocks when we can split M while staying bf16-sublane aligned.
    while (pl.cdiv(M, tm_e) * pl.cdiv(N, tn_e)) < 2 and tm_e % 32 == 0 and M > tm_e // 2:
        tm_e //= 2

    grid = (pl.cdiv(M, tm_e), pl.cdiv(N, tn_e), pl.cdiv(K, tk_e))
    gi, gj, gk = grid
    mask_k_tail = (K % tk_e) != 0

    kernel = functools.partial(
        _linear_kernel, K=K, tk=tk_e, mask_k_tail=mask_k_tail
    )

    # VMEM budget: double-buffered bf16 input tiles + f32 acc + double-buffered
    # f32 output tile.  Keep an explicit limit (raises v5e's 16 MiB default,
    # stays well under v7x's 64 MiB physical per TensorCore).
    vmem_need = (
        2 * (tm_e * tk_e + tk_e * tn_e) * 2  # bf16 inputs, double-buffered
        + tm_e * tn_e * 4                    # f32 accumulator scratch
        + 2 * tm_e * tn_e * 4                # f32 output, double-buffered
        + 2 * tn_e * 4                       # bias
    )
    vmem_limit = max(32 << 20, min(64 << 20, 2 * vmem_need))

    out = pl.pallas_call(
        kernel,
        out_shape=jax.ShapeDtypeStruct((M, N), out_dtype),
        grid_spec=pltpu.PrefetchScalarGridSpec(
            num_scalar_prefetch=0,
            grid=grid,
            in_specs=[
                pl.BlockSpec((tm_e, tk_e), lambda i, j, k: (i, k)),
                pl.BlockSpec((tk_e, tn_e), lambda i, j, k: (k, j)),
                pl.BlockSpec((1, tn_e), lambda i, j, k: (0, j)),
            ],
            out_specs=pl.BlockSpec((tm_e, tn_e), lambda i, j, k: (i, j)),
            scratch_shapes=[pltpu.VMEM((tm_e, tn_e), jnp.float32)],
        ),
        compiler_params=pltpu.CompilerParams(
            dimension_semantics=("parallel", "parallel", "arbitrary"),
            vmem_limit_bytes=int(vmem_limit),
        ),
        cost_estimate=pl.CostEstimate(
            flops=2 * M * N * K,
            transcendentals=0,
            # Include re-streaming: X is read once per j-block, W once per
            # i-block (bf16 = 2 bytes); bias + f32 output.
            bytes_accessed=gj * M * K * 2 + gi * K * N * 2 + gi * N * 4 + M * N * 4,
        ),
    )(xb, wb, bp)

    return out


# --------------------------- Module definitions -----------------------------
class PallasLinear:
    """Deterministically-initialized Linear backed by the Pallas kernel."""

    def __init__(self, in_features, out_features, key, *, force_pallas=False,
                 tm=512, tn=512, tk=512):
        kw, kb = jax.random.split(key)
        bound = 1.0 / (in_features ** 0.5)
        self.weight = jax.random.uniform(
            kw, (in_features, out_features), jnp.float32, -bound, bound
        )
        self.bias = jax.random.uniform(
            kb, (out_features,), jnp.float32, -bound, bound
        )
        self.force_pallas = force_pallas
        self.tiles = (tm, tn, tk)

    def __call__(self, x):
        tm, tn, tk = self.tiles
        return pallas_linear(
            x, self.weight, self.bias,
            tm=tm, tn=tn, tk=tk, force_pallas=self.force_pallas,
        )


class ModuleWrapper:
    """JAX equivalent of _ModuleWrapper: forwards everything to the inner module."""

    def __init__(self, module):
        self.module = module

    def __call__(self, *args, **kwargs):
        return self.module(*args, **kwargs)


# --------------------------------- Demo -------------------------------------
def _check(y, x, w, b):
    # Reference matches the kernel's numerics: bf16 operands, f32 accumulation,
    # f32 bias add.
    y_ref = jnp.dot(
        x.astype(jnp.bfloat16), w.astype(jnp.bfloat16),
        preferred_element_type=jnp.float32,
    ) + b
    assert y.shape == y_ref.shape, (y.shape, y_ref.shape)
    err = float(jnp.max(jnp.abs(y.astype(jnp.float32) - y_ref)))
    assert jnp.allclose(y.astype(jnp.float32), y_ref, atol=1e-2, rtol=1e-2), err


if __name__ == "__main__":
    key = jax.random.PRNGKey(0)
    k_x1, k_m1, k_x2, k_m2, k_x3, k_m3, k_x4, k_m4 = jax.random.split(key, 8)

    # Case 1: tiny shape -> hits the XLA fallback path (fused HLO wins there).
    x1 = jax.random.normal(k_x1, (8, 32), jnp.float32)
    m1 = ModuleWrapper(PallasLinear(32, 32, k_m1))
    y1 = m1(x1)
    jax.block_until_ready(y1)
    y1_ref = x1 @ m1.module.weight + m1.module.bias
    assert jnp.allclose(y1, y1_ref, atol=1e-4, rtol=1e-4)

    # Case 2: same tiny shape forced through Pallas -> full-dim single-tile
    # path (no padding, no OOB blocks).
    m2 = ModuleWrapper(PallasLinear(32, 32, k_m2, force_pallas=True))
    x2 = jax.random.normal(k_x2, (8, 32), jnp.float32)
    y2 = m2(x2)
    jax.block_until_ready(y2)
    _check(y2, x2, m2.module.weight, m2.module.bias)

    # Case 3: aligned mid-size problem -> megacore guard splits M into 2
    # blocks so both TensorCores (v7x) get work; single resident K step.
    x3 = jax.random.normal(k_x3, (256, 512), jnp.float32)
    m3 = ModuleWrapper(PallasLinear(512, 512, k_m3))
    y3 = m3(x3)
    jax.block_until_ready(y3)
    _check(y3, x3, m3.module.weight, m3.module.bias)

    # Case 4: misaligned shapes with small forced tiles -> exercises partial
    # M/N output blocks (masked stores, no HBM padding) and the in-kernel
    # K-tail zeroing on both operands.
    x4 = jax.random.normal(k_x4, (40, 200), jnp.float32)
    m4 = ModuleWrapper(
        PallasLinear(200, 160, k_m4, force_pallas=True, tm=32, tn=128, tk=128)
    )
    y4 = m4(x4)
    jax.block_until_ready(y4)
    _check(y4, x4, m4.module.weight, m4.module.bias)

    print("KERNEL_OK")
</pallas_src>

<mosaic_0001>
module attributes {stable_mosaic.version = 11 : i64} {
  func.func @_linear_kernel(%arg0: i32, %arg1: i32, %arg2: i32, %arg3: memref<8x32xbf16, #tpu.memory_space<vmem>>, %arg4: memref<32x32xbf16, #tpu.memory_space<vmem>>, %arg5: memref<1x32xf32, #tpu.memory_space<vmem>>, %arg6: memref<8x32xf32, #tpu.memory_space<vmem>>, %arg7: memref<8x32xf32, #tpu.memory_space<vmem>>) attributes {dimension_semantics = [#tpu.dimension_semantics<parallel>, #tpu.dimension_semantics<parallel>, #tpu.dimension_semantics<arbitrary>], iteration_bounds = array<i64: 1, 1, 1>, scalar_prefetch = 0 : i64, scratch_operands = 1 : i64, tpu.core_type = #tpu.core_type<tc>, window_params = [{transform_indices = @transform_0, window_bounds = array<i64: 8, 32>}, {transform_indices = @transform_1, window_bounds = array<i64: 32, 32>}, {transform_indices = @transform_2, window_bounds = array<i64: 1, 32>}, {transform_indices = @transform_3, window_bounds = array<i64: 8, 32>}]} {
    %c0_i32 = arith.constant 0 : i32
    %0 = arith.cmpi eq, %arg2, %c0_i32 : i32
    %1 = arith.extui %0 : i1 to i32
    %c0_i32_0 = arith.constant 0 : i32
    %2 = arith.cmpi ne, %1, %c0_i32_0 : i32
    scf.if %2 {
      %c0_10 = arith.constant 0 : index
      %c0_11 = arith.constant 0 : index
      %12 = vector.load %arg5[%c0_10, %c0_11] : memref<1x32xf32, #tpu.memory_space<vmem>>, vector<1x32xf32>
      %13 = vector.shape_cast %12 : vector<1x32xf32> to vector<1x32xf32>
      %14 = vector.broadcast %13 : vector<1x32xf32> to vector<8x32xf32>
      %c0_12 = arith.constant 0 : index
      %c0_13 = arith.constant 0 : index
      %15 = vector.load %arg7[%c0_12, %c0_13] : memref<8x32xf32, #tpu.memory_space<vmem>>, vector<8x32xf32>
      tpu.vector_store %arg7[%c0_12, %c0_13], %14 {strides = array<i32>} : memref<8x32xf32, #tpu.memory_space<vmem>>, vector<8x32xf32>,
    } else {
    }
    %c0 = arith.constant 0 : index
    %c0_1 = arith.constant 0 : index
    %3 = vector.load %arg3[%c0, %c0_1] : memref<8x32xbf16, #tpu.memory_space<vmem>>, vector<8x32xbf16>
    %c0_2 = arith.constant 0 : index
    %c0_3 = arith.constant 0 : index
    %4 = vector.load %arg4[%c0_2, %c0_3] : memref<32x32xbf16, #tpu.memory_space<vmem>>, vector<32x32xbf16>
    %c0_4 = arith.constant 0 : index
    %c0_5 = arith.constant 0 : index
    %5 = vector.load %arg7[%c0_4, %c0_5] : memref<8x32xf32, #tpu.memory_space<vmem>>, vector<8x32xf32>
    %cst = arith.constant dense<0.000000e+00> : vector<8x32xf32>
    %6 = tpu.matmul %3, %4, %cst {dimension_numbers = #tpu.dot_dimension_numbers<[1], [0], [0], [1], [0, 0, 1, 1], [], []>} : vector<8x32xbf16>, vector<32x32xbf16>, vector<8x32xf32> -> vector<8x32xf32>
    %7 = arith.addf %5, %6 : vector<8x32xf32>
    %c0_6 = arith.constant 0 : index
    %c0_7 = arith.constant 0 : index
    %8 = vector.load %arg7[%c0_6, %c0_7] : memref<8x32xf32, #tpu.memory_space<vmem>>, vector<8x32xf32>
    tpu.vector_store %arg7[%c0_6, %c0_7], %7 {strides = array<i32>} : memref<8x32xf32, #tpu.memory_space<vmem>>, vector<8x32xf32>,
    %c0_i32_8 = arith.constant 0 : i32
    %9 = arith.cmpi eq, %arg2, %c0_i32_8 : i32
    %10 = arith.extui %9 : i1 to i32
    %c0_i32_9 = arith.constant 0 : i32
    %11 = arith.cmpi ne, %10, %c0_i32_9 : i32
    scf.if %11 {
      %c0_10 = arith.constant 0 : index
      %c0_11 = arith.constant 0 : index
      %12 = vector.load %arg7[%c0_10, %c0_11] : memref<8x32xf32, #tpu.memory_space<vmem>>, vector<8x32xf32>
      %c0_12 = arith.constant 0 : index
      %c0_13 = arith.constant 0 : index
      %13 = vector.load %arg6[%c0_12, %c0_13] : memref<8x32xf32, #tpu.memory_space<vmem>>, vector<8x32xf32>
      tpu.vector_store %arg6[%c0_12, %c0_13], %12 {strides = array<i32>} : memref<8x32xf32, #tpu.memory_space<vmem>>, vector<8x32xf32>,
    } else {
    }
    return
  }
  func.func @transform_0(%arg0: i32, %arg1: i32, %arg2: i32) -> (i32, i32) {
    %c0_i32 = arith.constant 0 : i32
    return %arg0, %arg2 : i32, i32
  }
  func.func @transform_1(%arg0: i32, %arg1: i32, %arg2: i32) -> (i32, i32) {
    %c0_i32 = arith.constant 0 : i32
    return %arg2, %arg1 : i32, i32
  }
  func.func @transform_2(%arg0: i32, %arg1: i32, %arg2: i32) -> (i32, i32) {
    %c0_i32 = arith.constant 0 : i32
    %c0_i32_0 = arith.constant 0 : i32
    return %c0_i32, %arg1 : i32, i32
  }
  func.func @transform_3(%arg0: i32, %arg1: i32, %arg2: i32) -> (i32, i32) {
    %c0_i32 = arith.constant 0 : i32
    return %arg0, %arg1 : i32, i32
  }
}

</mosaic_0001>

<bundles_post_ra>
// kernel: tpu_custom_call.1
= control target key start
LH: loop header
LB: loop body
LE: loop exit
PB: predicated region body
PF: predicated region fallthrough
CT: control target
= control target key end

     0   :  { %8 = vsyncpa [#allocation4], 0  ;;  %s252_s0 = inlined_call_operand.hbm [shape: bf16[8,32], index: 0, kind: input, shape index: {}]   ;;  %s253_s1 = inlined_call_operand.hbm [shape: bf16[32,32], index: 1, kind: input, shape index: {}]   ;;  %s254_s2 = inlined_call_operand.vmem [shape: f32[1,32], index: 2, kind: input, shape index: {}]   ;;  %s255_s3 = inlined_call_operand.hbm [shape: f32[8,32], index: 3, kind: output, shape index: {}]  }
   0x1   :  { %9 = vsyncpa [#allocation7], 0 }
   0x2   :  { %10 = vsyncpa [#allocation5], 0  ;;  %s16_s14 = sshll.u32 %s252_s0, 4  ;;  %s211_s15 = smov [#allocation3]   ;;  %s17_s14 = int_to_ptr.hbm [resolvable:$true] %s16_s14 }
   0x3   :  { %s18_s16 = sshll.u32 %s211_s15, 4  ;;  %s26_s19 = sshll.u32 %s253_s1, 4  ;;  %s19_s16 = int_to_ptr.vmem [resolvable:$true] %s18_s16  ;;  %s27_s19 = int_to_ptr.hbm [resolvable:$true] %s26_s19 }
   0x4   :  { %21 = dma.hbm_to_vmem [thread:$0]  %s17_s14, 64, %s19_s16, [#allocation4]  }
   0x5   :  { %s212_s20 = smov [#allocation6]   ;;  %s213_s22 = smov 64  }
   0x6   :  { %s28_s21 = sshll.u32 %s212_s20, 4  ;;  %s214_s23 = smov 4   ;;  %s29_s21 = int_to_ptr.vmem [resolvable:$true] %s28_s21 }
   0x7   :  { %34 = dma.hbm_to_vmem [thread:$0]  %s27_s19, 256, %s29_s21, [#allocation7], %s213_s22, %s213_s22, %s214_s23  }
   0x8   :  { %205 = dma.done.wait [#allocation4], 64  }
   0x9   :  { %206 = vsyncadd [#allocation4], 4294967232 }
   0xa   :  { %207 = dma.done.wait [#allocation7], 256  }
   0xb   :  { %208 = vsyncadd [#allocation7], 4294967040  ;;  %v126_v0 = vld [vmem:[#allocation6 + $0x8] sm:$0xff]  ;;  %v132_v1 = vld [vmem:[%s254_s2] ss:$0 sm:$0xff]  ;;  %vm54_vm0 = vcmask 261120  }
   0xc   :  { %84 = vmatpush.bf16.msra.mxu0 %v126_v0  ;;  %v125_v2 = vld [vmem:[#allocation6] sm:$0xff]  ;;  %55 = vst.msk [vmem:[#allocation2] sm:$0xff] %vm54_vm0, %v132_v1  ;;  %v56_v3 = vld [vmem:[#allocation3] sm:$0xf]  ;;  %s215_s1 = smov [#allocation8]   ;;  %s105_s2 = sshll.u32 %s255_s3, 4  ;;  %s106_s2 = int_to_ptr.hbm [resolvable:$true] %s105_s2 }
   0xd   :  { %s103_s25 = sshll.u32 %s215_s1, 4  ;;  %s104_s25 = int_to_ptr.vmem [resolvable:$true] %s103_s25 }
  0x10   :  { %85 = vmatpush.bf16.msra.mxu0 %v125_v2 }
  0x13   :  { %124 = vmatmul.msk.bf16.vlgmr.msra.gmra.mxu0 %vm54_vm0, %v56_v3  ;;  %v61_v4 = vld [vmem:[#allocation2] sm:$0xff] }
  0x90   :  { %v87_v5 = vpop.f32.mrf.mxu0 }
  0x91   :  { %v91_v6 = vadd.f32 %v87_v5, %v61_v4 }
  0x93   :  { %92 = vst.msk [vmem:[#allocation2] sm:$0xff] %vm54_vm0, %v91_v6 }
  0x98   :  { %v89_v7 = vpop.f32.mrf.mxu0 }
  0x9a   :  { %v96_v8 = vld [vmem:[#allocation2] sm:$0xff] }
  0x9b   :  { %97 = vst.msk [vmem:[#allocation8] sm:$0xff] %vm54_vm0, %v96_v8 }
  0x9c   :  { %108 = dma.vmem_to_hbm [thread:$0]  %s104_s25, 128, %s106_s2, [#allocation5]  }
  0x9d   :  { %209 = dma.done.wait [#allocation5], 128  }
  0x9e   :  { %210 = vsyncadd [#allocation5], 4294967168 }
  0x9f   :  { %113 = vsyncpa [#allocation4], 1 }
  0xa0   :  { %114 = vsyncpa [#allocation7], 1 }
  0xa1   :  { %115 = vsyncpa [#allocation5], 1 }

</bundles_post_ra>
